<compile_context>
chip_gen: v7x
topology: tpu7x:2x2x1
jax: 0.10.0
libtpu: 0.0.40
codegen_flags: <defaults>
</compile_context>

<pallas_src>
import functools
import math

import jax
import jax.numpy as jnp
from jax.experimental import pallas as pl
from jax.experimental.pallas import tpu as pltpu

_NEG_BIG = -1e30  # finite large-negative mask bias (NaN-safe)


def _flash_attention_kernel(q_ref, kT_ref, v_ref, o_ref,
                            m_scr, l_scr, acc_scr,
                            *, tq, tk, seq_len, is_causal, mask_pad,
                            compute_dtype):
    qi = pl.program_id(1)
    ki = pl.program_id(2)

    # ---- init running softmax state at the first KV tile of each (bh, qi). --
    @pl.when(ki == 0)
    def _():
        m_scr[...] = jnp.full(m_scr.shape, _NEG_BIG, m_scr.dtype)
        l_scr[...] = jnp.zeros(l_scr.shape, l_scr.dtype)
        acc_scr[...] = jnp.zeros(acc_scr.shape, acc_scr.dtype)

    def _process_tile():
        q = q_ref[0]                      # (tq, Dh) compute_dtype
        kT = kT_ref[0]                    # (Dh, tk) compute_dtype (pre-transposed)
        v = v_ref[0]                      # (tk, Dh) compute_dtype

        # Scores: plain NN contraction, f32 MXU accumulation.  Scale is already
        # folded into the Q projection weights.
        s = jnp.dot(q, kT, preferred_element_type=jnp.float32)    # (tq, tk)

        if is_causal or mask_pad:
            col = ki * tk + jax.lax.broadcasted_iota(jnp.int32, (tq, tk), 1)
            valid = None
            if mask_pad:                  # mask zero-padded key columns
                valid = col < seq_len
            if is_causal:
                row = qi * tq + jax.lax.broadcasted_iota(jnp.int32, (tq, tk), 0)
                causal_ok = col <= row
                valid = causal_ok if valid is None else (valid & causal_ok)
            s = jnp.where(valid, s, jnp.float32(_NEG_BIG))

        # Online (flash) softmax update in f32.
        m_prev = m_scr[...]                                         # (tq, 1)
        m_new = jnp.maximum(m_prev, jnp.max(s, axis=-1, keepdims=True))
        alpha = jnp.exp(m_prev - m_new)
        p = jnp.exp(s - m_new)
        l_scr[...] = alpha * l_scr[...] + jnp.sum(p, axis=-1, keepdims=True)
        acc_scr[...] = alpha * acc_scr[...] + jnp.dot(
            p.astype(compute_dtype), v, preferred_element_type=jnp.float32)
        m_scr[...] = m_new

    if is_causal:
        # Skip KV tiles lying entirely above the causal diagonal.
        pl.when(ki * tk <= qi * tq + (tq - 1))(_process_tile)
    else:
        _process_tile()

    # ---- finalize: runs unconditionally on the last KV step. ----------------
    @pl.when(ki == pl.num_programs(2) - 1)
    def _():
        inv_l = pl.reciprocal(l_scr[...], approx=True)
        o_ref[0] = (acc_scr[...] * inv_l).astype(o_ref.dtype)


def _round_up(x, m):
    return (x + m - 1) // m * m


def _flash_attention(qh, kh, vh, *, is_causal, block_q, block_k,
                     compute_dtype, vmem_limit_bytes):
    """qh/kh/vh: (B*H, N, Dh) projected, head-major (Q already scaled)."""
    BH, N, Dh = qh.shape

    tq = block_q if N > block_q else _round_up(N, 8)
    tk = block_k if N > block_k else _round_up(N, 8)
    nq = _round_up(N, tq)
    nk = _round_up(N, tk)
    if nq > tq:
        assert tq % 8 == 0, "block_q must be a multiple of 8"
    if nk > tk:
        # K is stored transposed, so tk is the lane dimension of its blocks.
        assert tk % 128 == 0, "block_k must be a multiple of 128 when KV is tiled"
    mask_pad = nk != N

    def pad_seq(x, n_to):
        if x.shape[1] == n_to:
            return x
        return jnp.pad(x, ((0, 0), (0, n_to - x.shape[1]), (0, 0)))

    qh = pad_seq(qh, nq).astype(compute_dtype)
    kh = pad_seq(kh, nk).astype(compute_dtype)
    vh = pad_seq(vh, nk).astype(compute_dtype)
    # Pre-transpose K so the score matmul inside the kernel is NN (no per-tile
    # transpose / XLU work on the K block).
    khT = jnp.swapaxes(kh, 1, 2)                                   # (BH, Dh, nk)

    grid = (BH, nq // tq, nk // tk)

    kernel = functools.partial(
        _flash_attention_kernel, tq=tq, tk=tk, seq_len=N,
        is_causal=is_causal, mask_pad=mask_pad, compute_dtype=compute_dtype)

    cp_kwargs = dict(dimension_semantics=("parallel", "parallel", "arbitrary"))
    if vmem_limit_bytes is not None:
        cp_kwargs["vmem_limit_bytes"] = vmem_limit_bytes

    out = pl.pallas_call(
        kernel,
        out_shape=jax.ShapeDtypeStruct((BH, nq, Dh), jnp.float32),
        grid_spec=pltpu.PrefetchScalarGridSpec(
            num_scalar_prefetch=0,
            grid=grid,
            in_specs=[
                pl.BlockSpec((1, tq, Dh), lambda b, i, j: (b, i, 0)),   # Q tile
                pl.BlockSpec((1, Dh, tk), lambda b, i, j: (b, 0, j)),   # K^T tile
                pl.BlockSpec((1, tk, Dh), lambda b, i, j: (b, j, 0)),   # V tile
            ],
            out_specs=pl.BlockSpec((1, tq, Dh), lambda b, i, j: (b, i, 0)),
            scratch_shapes=[
                pltpu.VMEM((tq, 1), jnp.float32),     # running max  m
                pltpu.VMEM((tq, 1), jnp.float32),     # running sum  l
                pltpu.VMEM((tq, Dh), jnp.float32),    # output accumulator
            ],
        ),
        compiler_params=pltpu.CompilerParams(**cp_kwargs),
    )(qh, khT, vh)

    if nq != N:
        out = out[:, :N, :]
    return out


def aci_attention(q, k, v, params, *, num_heads, is_causal=False,
                  block_q=256, block_k=256, compute_dtype=jnp.bfloat16,
                  vmem_limit_bytes=None):
    """ACIAttention forward.  q, k, v: (B, N, D).

    params: projection weights stored as (in_features, out_features) (transpose
    of PyTorch's nn.Linear storage); biases as (1, out_features).
    """
    B, N, D = q.shape
    H = num_heads
    Dh = D                                # head_dim == d_model in this module
    HD = H * Dh
    f32 = jnp.float32
    scale = 1.0 / math.sqrt(Dh)

    # ---- input projections: plain XLA matmuls (wide, MXU-friendly).  The
    # softmax scale is folded into the Q projection.
    qp = q.astype(f32) @ (params["wq"].astype(f32) * scale) \
        + params["bq"].astype(f32)[0] * scale
    kp = k.astype(f32) @ params["wk"].astype(f32) + params["bk"].astype(f32)[0]
    vp = v.astype(f32) @ params["wv"].astype(f32) + params["bv"].astype(f32)[0]

    def head_major(x):                    # (B, N, H*Dh) -> (B*H, N, Dh)
        return x.reshape(B, N, H, Dh).transpose(0, 2, 1, 3).reshape(B * H, N, Dh)

    ctx = _flash_attention(head_major(qp), head_major(kp), head_major(vp),
                           is_causal=is_causal, block_q=block_q,
                           block_k=block_k, compute_dtype=compute_dtype,
                           vmem_limit_bytes=vmem_limit_bytes)

    # (B*H, N, Dh) -> (B, N, H*Dh), then the output projection in XLA.
    ctx = ctx.reshape(B, H, N, Dh).transpose(0, 2, 1, 3).reshape(B, N, HD)
    out = ctx @ params["wo"].astype(f32) + params["bo"].astype(f32)[0]
    return out.astype(q.dtype)


def _reference(q, k, v, params, *, num_heads, is_causal=False):
    """Pure-JAX reference mirroring the PyTorch forward (dropout disabled)."""
    B, N, D = q.shape
    Q = q @ params["wq"] + params["bq"][0]
    K = k @ params["wk"] + params["bk"][0]
    V = v @ params["wv"] + params["bv"][0]

    def split(x):                         # 'b n (h d) -> b h n d'
        return x.reshape(B, N, num_heads, D).transpose(0, 2, 1, 3)

    Qh, Kh, Vh = split(Q), split(K), split(V)
    S = jnp.einsum("bhnd,bhmd->bhnm", Qh, Kh) / math.sqrt(D)
    if is_causal:
        mask = jnp.tril(jnp.ones((N, N), bool))
        S = jnp.where(mask, S, -jnp.inf)
    P = jax.nn.softmax(S, axis=-1)
    A = jnp.einsum("bhnm,bhmd->bhnd", P, Vh)
    A = A.transpose(0, 2, 1, 3).reshape(B, N, num_heads * D)
    return A @ params["wo"] + params["bo"][0]


if __name__ == "__main__":
    B, N, D = 2, 8, 32
    NUM_HEADS = 2
    HD = D * NUM_HEADS

    key = jax.random.PRNGKey(0)
    keys = jax.random.split(key, 11)

    params = {
        "wq": jax.random.normal(keys[0], (D, HD), jnp.float32) * 0.05,
        "bq": jax.random.normal(keys[1], (1, HD), jnp.float32) * 0.05,
        "wk": jax.random.normal(keys[2], (D, HD), jnp.float32) * 0.05,
        "bk": jax.random.normal(keys[3], (1, HD), jnp.float32) * 0.05,
        "wv": jax.random.normal(keys[4], (D, HD), jnp.float32) * 0.05,
        "bv": jax.random.normal(keys[5], (1, HD), jnp.float32) * 0.05,
        "wo": jax.random.normal(keys[6], (HD, D), jnp.float32) * 0.05,
        "bo": jax.random.normal(keys[7], (1, D), jnp.float32) * 0.05,
    }

    q = jax.random.normal(keys[8], (B, N, D), jnp.float32)
    k = jax.random.normal(keys[9], (B, N, D), jnp.float32)
    v = jax.random.normal(keys[10], (B, N, D), jnp.float32)

    # 1) f32 compute path, no causal mask (single tile per head).
    out_f32 = aci_attention(q, k, v, params, num_heads=NUM_HEADS,
                            is_causal=False, compute_dtype=jnp.float32)
    out_f32 = jax.block_until_ready(out_f32)
    ref = _reference(q, k, v, params, num_heads=NUM_HEADS, is_causal=False)
    assert out_f32.shape == (B, N, D)
    assert jnp.allclose(out_f32, ref, atol=1e-2, rtol=1e-2), "f32 mismatch"

    # 2) bf16 MXU fast path + causal masking.
    out_bf16 = aci_attention(q, k, v, params, num_heads=NUM_HEADS,
                             is_causal=True, compute_dtype=jnp.bfloat16)
    out_bf16 = jax.block_until_ready(out_bf16)
    ref_c = _reference(q, k, v, params, num_heads=NUM_HEADS, is_causal=True)
    assert out_bf16.shape == (B, N, D)
    assert jnp.allclose(out_bf16, ref_c, atol=5e-2, rtol=5e-2), "bf16 mismatch"

    # 3) Multi-tile path: N not a multiple of the tile -> exercises sequence
    #    padding + masking, the KV-tiled online softmax and causal tile skipping.
    N2 = 320
    q2 = jax.random.normal(jax.random.PRNGKey(1), (B, N2, D), jnp.float32)
    k2 = jax.random.normal(jax.random.PRNGKey(2), (B, N2, D), jnp.float32)
    v2 = jax.random.normal(jax.random.PRNGKey(3), (B, N2, D), jnp.float32)
    out_tiled = aci_attention(q2, k2, v2, params, num_heads=NUM_HEADS,
                              is_causal=True, compute_dtype=jnp.float32,
                              block_q=128, block_k=128)
    out_tiled = jax.block_until_ready(out_tiled)
    ref_t = _reference(q2, k2, v2, params, num_heads=NUM_HEADS, is_causal=True)
    assert out_tiled.shape == (B, N2, D)
    assert jnp.allclose(out_tiled, ref_t, atol=2e-2, rtol=2e-2), "tiled mismatch"

    print("KERNEL_OK")
</pallas_src>

<mosaic_0001>
module attributes {stable_mosaic.version = 11 : i64} {
  func.func @_flash_attention_kernel(%arg0: i32, %arg1: i32, %arg2: i32, %arg3: memref<1x8x32xf32, #tpu.memory_space<vmem>>, %arg4: memref<1x32x8xf32, #tpu.memory_space<vmem>>, %arg5: memref<1x8x32xf32, #tpu.memory_space<vmem>>, %arg6: memref<1x8x32xf32, #tpu.memory_space<vmem>>, %arg7: memref<8x1xf32, #tpu.memory_space<vmem>>, %arg8: memref<8x1xf32, #tpu.memory_space<vmem>>, %arg9: memref<8x32xf32, #tpu.memory_space<vmem>>) attributes {dimension_semantics = [#tpu.dimension_semantics<parallel>, #tpu.dimension_semantics<parallel>, #tpu.dimension_semantics<arbitrary>], iteration_bounds = array<i64: 4, 1, 1>, scalar_prefetch = 0 : i64, scratch_operands = 3 : i64, tpu.core_type = #tpu.core_type<tc>, window_params = [{transform_indices = @transform_0, window_bounds = array<i64: 1, 8, 32>}, {transform_indices = @transform_1, window_bounds = array<i64: 1, 32, 8>}, {transform_indices = @transform_2, window_bounds = array<i64: 1, 8, 32>}, {transform_indices = @transform_3, window_bounds = array<i64: 1, 8, 32>}]} {
    %c0_i32 = arith.constant 0 : i32
    %0 = arith.cmpi eq, %arg2, %c0_i32 : i32
    %1 = arith.extui %0 : i1 to i32
    %c0_i32_0 = arith.constant 0 : i32
    %2 = arith.cmpi ne, %1, %c0_i32_0 : i32
    scf.if %2 {
      %cst_26 = arith.constant -1.000000e+30 : f32
      %35 = vector.broadcast %cst_26 : f32 to vector<8x1xf32>
      %c0_27 = arith.constant 0 : index
      %c0_28 = arith.constant 0 : index
      %36 = vector.load %arg7[%c0_27, %c0_28] : memref<8x1xf32, #tpu.memory_space<vmem>>, vector<8x1xf32>
      tpu.vector_store %arg7[%c0_27, %c0_28], %35 {strides = array<i32>} : memref<8x1xf32, #tpu.memory_space<vmem>>, vector<8x1xf32>,
      %cst_29 = arith.constant 0.000000e+00 : f32
      %37 = vector.broadcast %cst_29 : f32 to vector<8x1xf32>
      %c0_30 = arith.constant 0 : index
      %c0_31 = arith.constant 0 : index
      %38 = vector.load %arg8[%c0_30, %c0_31] : memref<8x1xf32, #tpu.memory_space<vmem>>, vector<8x1xf32>
      tpu.vector_store %arg8[%c0_30, %c0_31], %37 {strides = array<i32>} : memref<8x1xf32, #tpu.memory_space<vmem>>, vector<8x1xf32>,
      %cst_32 = arith.constant 0.000000e+00 : f32
      %39 = vector.broadcast %cst_32 : f32 to vector<8x32xf32>
      %c0_33 = arith.constant 0 : index
      %c0_34 = arith.constant 0 : index
      %40 = vector.load %arg9[%c0_33, %c0_34] : memref<8x32xf32, #tpu.memory_space<vmem>>, vector<8x32xf32>
      tpu.vector_store %arg9[%c0_33, %c0_34], %39 {strides = array<i32>} : memref<8x32xf32, #tpu.memory_space<vmem>>, vector<8x32xf32>,
    } else {
    }
    %c0 = arith.constant 0 : index
    %c0_1 = arith.constant 0 : index
    %c0_2 = arith.constant 0 : index
    %3 = vector.load %arg3[%c0, %c0_1, %c0_2] : memref<1x8x32xf32, #tpu.memory_space<vmem>>, vector<1x8x32xf32>
    %4 = vector.shape_cast %3 : vector<1x8x32xf32> to vector<8x32xf32>
    %c0_3 = arith.constant 0 : index
    %c0_4 = arith.constant 0 : index
    %c0_5 = arith.constant 0 : index
    %5 = vector.load %arg4[%c0_3, %c0_4, %c0_5] : memref<1x32x8xf32, #tpu.memory_space<vmem>>, vector<1x32x8xf32>
    %6 = vector.shape_cast %5 : vector<1x32x8xf32> to vector<32x8xf32>
    %c0_6 = arith.constant 0 : index
    %c0_7 = arith.constant 0 : index
    %c0_8 = arith.constant 0 : index
    %7 = vector.load %arg5[%c0_6, %c0_7, %c0_8] : memref<1x8x32xf32, #tpu.memory_space<vmem>>, vector<1x8x32xf32>
    %8 = vector.shape_cast %7 : vector<1x8x32xf32> to vector<8x32xf32>
    %cst = arith.constant dense<0.000000e+00> : vector<8x8xf32>
    %9 = tpu.matmul %4, %6, %cst {dimension_numbers = #tpu.dot_dimension_numbers<[1], [0], [0], [1], [0, 0, 1, 1], [], []>} : vector<8x32xf32>, vector<32x8xf32>, vector<8x8xf32> -> vector<8x8xf32>
    %c0_9 = arith.constant 0 : index
    %c0_10 = arith.constant 0 : index
    %10 = vector.load %arg7[%c0_9, %c0_10] : memref<8x1xf32, #tpu.memory_space<vmem>>, vector<8x1xf32>
    %cst_11 = arith.constant dense<0xFF800000> : vector<8xf32>
    %11 = vector.multi_reduction <maximumf>, %9, %cst_11 [1] : vector<8x8xf32> to vector<8xf32>
    %12 = vector.shape_cast %11 : vector<8xf32> to vector<8x1xf32>
    %13 = arith.maximumf %10, %12 : vector<8x1xf32>
    %14 = arith.subf %10, %13 : vector<8x1xf32>
    %15 = math.exp %14 : vector<8x1xf32>
    %16 = vector.broadcast %13 : vector<8x1xf32> to vector<8x8xf32>
    %17 = arith.subf %9, %16 : vector<8x8xf32>
    %18 = math.exp %17 : vector<8x8xf32>
    %c0_12 = arith.constant 0 : index
    %c0_13 = arith.constant 0 : index
    %19 = vector.load %arg8[%c0_12, %c0_13] : memref<8x1xf32, #tpu.memory_space<vmem>>, vector<8x1xf32>
    %20 = arith.mulf %15, %19 : vector<8x1xf32>
    %cst_14 = arith.constant dense<0.000000e+00> : vector<8xf32>
    %21 = vector.multi_reduction <add>, %18, %cst_14 [1] : vector<8x8xf32> to vector<8xf32>
    %22 = vector.shape_cast %21 : vector<8xf32> to vector<8x1xf32>
    %23 = arith.addf %20, %22 : vector<8x1xf32>
    %c0_15 = arith.constant 0 : index
    %c0_16 = arith.constant 0 : index
    %24 = vector.load %arg8[%c0_15, %c0_16] : memref<8x1xf32, #tpu.memory_space<vmem>>, vector<8x1xf32>
    tpu.vector_store %arg8[%c0_15, %c0_16], %23 {strides = array<i32>} : memref<8x1xf32, #tpu.memory_space<vmem>>, vector<8x1xf32>,
    %c0_17 = arith.constant 0 : index
    %c0_18 = arith.constant 0 : index
    %25 = vector.load %arg9[%c0_17, %c0_18] : memref<8x32xf32, #tpu.memory_space<vmem>>, vector<8x32xf32>
    %26 = vector.broadcast %15 : vector<8x1xf32> to vector<8x32xf32>
    %27 = arith.mulf %26, %25 : vector<8x32xf32>
    %cst_19 = arith.constant dense<0.000000e+00> : vector<8x32xf32>
    %28 = tpu.matmul %18, %8, %cst_19 {dimension_numbers = #tpu.dot_dimension_numbers<[1], [0], [0], [1], [0, 0, 1, 1], [], []>} : vector<8x8xf32>, vector<8x32xf32>, vector<8x32xf32> -> vector<8x32xf32>
    %29 = arith.addf %27, %28 : vector<8x32xf32>
    %c0_20 = arith.constant 0 : index
    %c0_21 = arith.constant 0 : index
    %30 = vector.load %arg9[%c0_20, %c0_21] : memref<8x32xf32, #tpu.memory_space<vmem>>, vector<8x32xf32>
    tpu.vector_store %arg9[%c0_20, %c0_21], %29 {strides = array<i32>} : memref<8x32xf32, #tpu.memory_space<vmem>>, vector<8x32xf32>,
    %c0_22 = arith.constant 0 : index
    %c0_23 = arith.constant 0 : index
    %31 = vector.load %arg7[%c0_22, %c0_23] : memref<8x1xf32, #tpu.memory_space<vmem>>, vector<8x1xf32>
    tpu.vector_store %arg7[%c0_22, %c0_23], %13 {strides = array<i32>} : memref<8x1xf32, #tpu.memory_space<vmem>>, vector<8x1xf32>,
    %c0_i32_24 = arith.constant 0 : i32
    %32 = arith.cmpi eq, %arg2, %c0_i32_24 : i32
    %33 = arith.extui %32 : i1 to i32
    %c0_i32_25 = arith.constant 0 : i32
    %34 = arith.cmpi ne, %33, %c0_i32_25 : i32
    scf.if %34 {
      %c0_26 = arith.constant 0 : index
      %c0_27 = arith.constant 0 : index
      %35 = vector.load %arg8[%c0_26, %c0_27] : memref<8x1xf32, #tpu.memory_space<vmem>>, vector<8x1xf32>
      %36 = tpu.reciprocal %35 {approx = true} : vector<8x1xf32> -> vector<8x1xf32>
      %c0_28 = arith.constant 0 : index
      %c0_29 = arith.constant 0 : index
      %37 = vector.load %arg9[%c0_28, %c0_29] : memref<8x32xf32, #tpu.memory_space<vmem>>, vector<8x32xf32>
      %38 = vector.broadcast %36 : vector<8x1xf32> to vector<8x32xf32>
      %39 = arith.mulf %37, %38 : vector<8x32xf32>
      %c0_30 = arith.constant 0 : index
      %c0_31 = arith.constant 0 : index
      %c0_32 = arith.constant 0 : index
      %40 = vector.load %arg6[%c0_30, %c0_31, %c0_32] : memref<1x8x32xf32, #tpu.memory_space<vmem>>, vector<1x8x32xf32>
      %41 = vector.shape_cast %40 : vector<1x8x32xf32> to vector<8x32xf32>
      %42 = vector.shape_cast %39 : vector<8x32xf32> to vector<1x8x32xf32>
      tpu.vector_store %arg6[%c0_30, %c0_31, %c0_32], %42 {strides = array<i32>} : memref<1x8x32xf32, #tpu.memory_space<vmem>>, vector<1x8x32xf32>,
    } else {
    }
    return
  }
  func.func @transform_0(%arg0: i32, %arg1: i32, %arg2: i32) -> (i32, i32, i32) {
    %c0_i32 = arith.constant 0 : i32
    %c0_i32_0 = arith.constant 0 : i32
    return %arg0, %arg1, %c0_i32 : i32, i32, i32
  }
  func.func @transform_1(%arg0: i32, %arg1: i32, %arg2: i32) -> (i32, i32, i32) {
    %c0_i32 = arith.constant 0 : i32
    %c0_i32_0 = arith.constant 0 : i32
    return %arg0, %c0_i32, %arg2 : i32, i32, i32
  }
  func.func @transform_2(%arg0: i32, %arg1: i32, %arg2: i32) -> (i32, i32, i32) {
    %c0_i32 = arith.constant 0 : i32
    %c0_i32_0 = arith.constant 0 : i32
    return %arg0, %arg2, %c0_i32 : i32, i32, i32
  }
  func.func @transform_3(%arg0: i32, %arg1: i32, %arg2: i32) -> (i32, i32, i32) {
    %c0_i32 = arith.constant 0 : i32
    %c0_i32_0 = arith.constant 0 : i32
    return %arg0, %arg1, %c0_i32 : i32, i32, i32
  }
}

</mosaic_0001>

<bundles_post_ra>
// kernel: tpu_custom_call.1
= control target key start
LH: loop header
LB: loop body
LE: loop exit
PB: predicated region body
PF: predicated region fallthrough
CT: control target
= control target key end

     0   :  { %8 = vsyncpa [#allocation6], 0  ;;  %s942_s0 = inlined_call_operand.vmem [shape: f32[4,8,32], index: 0, kind: input, shape index: {}]   ;;  %s943_s1 = inlined_call_operand.vmem [shape: f32[4,32,8], index: 1, kind: input, shape index: {}]   ;;  %s944_s2 = inlined_call_operand.vmem [shape: f32[4,8,32], index: 2, kind: input, shape index: {}]   ;;  %s945_s3 = inlined_call_operand.hbm [shape: f32[4,8,32], index: 3, kind: output, shape index: {}]  }
   0x1   :  { %10 = vsyncpa [#allocation6 + $0x1], 0  ;;  %s809_s12 = smov 0   ;;  %s811_s13 = smov 0  }
   0x2   :  { %s813_s14 = smov 0   ;;  %s815_s15 = smov 0  }
   0x3   :  { %s817_s16 = smov 0   ;;  %s819_s17 = smov 0  }
   0x4 LB: > { %s589_s18 = sadd.s32 4294967295, %s781_s17   ;;  %s590_s19 = sadd.s32 4294967294, %s781_s17   ;;  %s781_s17 = sphi %s819_s17, %s16_s17   ;;  %s777_s16 = sphi %s817_s16, %s952_s16   ;;  %s773_s15 = sphi %s815_s15, %s951_s15   ;;  %s769_s14 = sphi %s813_s14, %s950_s14   ;;  %s765_s13 = sphi %s811_s13, %s949_s13   ;;  %s761_s12 = sphi %s809_s12, %s948_s12  }
   0x5   : > { %s35_s20 = sadd.s32 1, %s777_s16  ;;  %s128_s21 = sadd.s32 1, %s769_s14 }
   0x6   : > { %p37_p0 = scmp.ge.s32.totalorder %s35_s20, 4  ;;  %p138_p1 = scmp.ne.s32.totalorder %s769_s14, %s765_s13 }
   0x7   : > { %p139_p2 = scmp.eq.s32.totalorder %s589_s18, 3  ;;  %p144_p3 = scmp.ne.s32.totalorder %s765_s13, %s761_s12 }
   0x8   : > { %s954_s20 = smov (%p37_p0, %s35_s20), 0  ;;  %p145_p5 = scmp.eq.s32.totalorder %s590_s19, 3 }
   0x9   : > { %p849_p4 = por %p139_p2, %p138_p1  ;;  %s123_s23 = ssub.s32 %s777_s16, %s954_s20 }
   0xa   : > { %p593_p6 = scmp.ge.s32.totalorder %s781_s17, 1  ;;  %p126_p7 = scmp.eq.s32.totalorder %s123_s23, 0 }
   0xb   : > { %p856_p8 = por %p145_p5, %p144_p3  ;;  %p194_p9 = scmp.lt.s32.totalorder %s781_s17, 5 }
   0xc   : > { %s862_s25 = scalar_select %p126_p7, %s769_s14, %s128_s21  }
   0xd   : > { %p195_p10 = pnand %p593_p6, %p194_p9 }
   0xe   : > { %p235_p11 = scmp.lt.s32.totalorder (!%p195_p10), %s773_s15, 3  ;;  %vm264_vm0 = vcmask (!%p195_p10), 261120   ;;  %v783_v0 = vmov (!%p195_p10), 0.0|0.0   ;;  %vm784_vm1 = vmmov (!%p195_p10), 0   ;;  %v785_v1 = vmov (!%p195_p10), 0.0   ;;  %s232_s11 = sand.u32 (!%p195_p10), 1, %s765_s13  }
   0xf   : > { %198 = sbr.rel (%p195_p10) target bundleno = 844 (0x34c), region = 32  ;;  %629 = vmatprep.subr.bf16.mxu0 (!%p195_p10), %v783_v0  ;;  %621 = vmatprep.mubr.msk.f32.mxu0 (!%p195_p10), %vm784_vm1, %v785_v1  ;;  %265 = vst.msk [vmem:[#allocation4] sm:$0xff] (!%p195_p10), %vm264_vm0, %v785_v1  ;;  %vm261_vm2 = vcmask (!%p195_p10), 7168   ;;  %v786_v9 = vmov (!%p195_p10), -1e+30   ;;  %vm347_vm3 = vcmask (!%p195_p10), 64512  }
  0x10   : > { %624 = vmatprep.subr.mxu1 (!%p195_p10), %v785_v1  ;;  %626 = vmatprep.mubr.msk.f32.mxu1 (!%p195_p10), %vm784_vm1, %v785_v1  ;;  %262 = vst.msk [vmem:[#allocation2] sm:$0xff] (!%p195_p10), %vm261_vm2, %v786_v9  ;;  %263 = vst.msk [vmem:[#allocation3] sm:$0xff] (!%p195_p10), %vm261_vm2, %v785_v1  ;;  %v787_v13 = vmov (!%p195_p10), 0   ;;  %s594_s18 = sshll.u32 (!%p195_p10), %s232_s11, 3  ;;  %s602_s19 = sshll.u32 (!%p195_p10), %s773_s15, 7 }
  0x11   : > { %695 = vset.pattern.permute.xlu0 (!%p195_p10), %v787_v13  ;;  %696 = vset.pattern.permute.xlu1 (!%p195_p10), %v787_v13  ;;  %s234_s21 = scalar_lea.vmem (!%p195_p10), [#allocation5], %s594_s18  ;;  %s894_s28 = scalar_lea.hbm (!%p195_p10), %s945_s3, %s602_s19 }
  0x12   : > { %s482_s23 = sshll.u32 (!%p195_p10), %s234_s21, 4  ;;  %s468_s29 = scalar_lea.sflag (!%p195_p10), [#allocation6], %s232_s11  ;;  %s896_s23 = int_to_ptr.vmem [resolvable:$true] %s482_s23 }
  0x16   : > { %s867_s26 = scalar_select %p235_p11, %s773_s15, 3  ;;  %v371_v32 = vld [vmem:[#allocation4] sm:$0xff] }
  0x17   : > { %v346_v14 = vld [vmem:[#allocation2] sm:$0xff]  ;;  %v363_v26 = vld [vmem:[#allocation3] sm:$0xff]  ;;  %s788_s15 = smov [#allocation5]  }
  0x18   : > { %s605_s27 = sshll.u32 %s867_s26, 5  ;;  %s595_s4 = sshll.u32 %s867_s26, 3 }
  0x19   : > { %s249_s30 = scalar_lea.vmem %s943_s1, %s605_s27  ;;  %s241_s7 = scalar_lea.vmem %s942_s0, %s595_s4 }
  0x1a   : > { %v267_v2 = vld [vmem:[%s249_s30] sm:$0xff]  ;;  %v268_v3 = vld [vmem:[%s249_s30 + $0x8] sm:$0xff]  ;;  %v269_v4 = vld [vmem:[%s249_s30 + $0x10] sm:$0xff]  ;;  %s256_s10 = scalar_lea.vmem %s944_s2, %s595_s4  ;;  %s707_s4 = sshll.u32 %s788_s15, 4  ;;  %s708_s4 = int_to_ptr.vmem [resolvable:$false] %s707_s4 }
  0x1b   : > { %v630_v5 = vpack.c.bf16 %v268_v3, %v267_v2  ;;  %v270_v6 = vld [vmem:[%s249_s30 + $0x18] sm:$0xff]  ;;  %v266_v8 = vld [vmem:[%s241_s7] sm:$0xff]  ;;  %s703_s30 = scalar_lea.vmem %s896_s23, 128  ;;  %s709_s5 = scalar_lea.vmem %s708_s4, 256 }
  0x1c   : > { %v633_v7 = vpack.c.bf16 %v270_v6, %v269_v4  ;;  %v271_v18 = vld [vmem:[%s256_s10] sm:$0xff]  ;;  %p704_p12 = scmp.ne.s32.totalorder %s896_s23, %s703_s30  ;;  %p710_p1 = scmp.lt.s32.totalorder %s896_s23, %s708_s4 }
  0x1d   : > { %631 = vmatpush3.bf16.msra.mxu0 %v630_v5  ;;  %625 = vmatpush3.msra.mxu1 %v271_v18  ;;  %p711_p2 = scmp.lt.s32.totalorder %s709_s5, %s703_s30 }
  0x1e   : > { %632 = vmatprep.subr.bf16.mxu0 %v783_v0  ;;  %p705_p13 = pnand %p704_p12, %p849_p4 }
  0x1f   : > { %p712_p3 = por %p711_p2, %p710_p1 }
  0x20   : > { %p706_p0 = pneg %p705_p13 }
  0x21   : > { %634 = vmatpush3.bf16.msra.mxu0 %v633_v7 }
  0x22   : > { %p713_p5 = pnand %p712_p3, %p706_p0 }
  0x24   : > { %622 = vmatmul.mubr.msk.f32.vlgmr.msra.gmra.mrb[0].mxu0 %vm264_vm0, %v266_v8 }
  0xf7   : > { %v342_v10 = vpop.f32.mrb[0].mxu0 }
  0xf8   : > { %v623_v11 = vpop.f32.mrb[1].mxu0  ;;  %v348_v12 = vsel %vm347_vm3, %v342_v10, -inf }
  0xf9   : > { %349 = vmax.xlane.f32.xlu0 %v348_v12 }
 0x186   : > { %v350_v15 = vpop.xlane.xlu0 %349 }
 0x187   : > { %v351_v16 = vmax.f32 %v346_v14, %v350_v15 }
 0x189   : > { %v352_v17 = vsub.f32 %v346_v14, %v351_v16  ;;  %453 = vst.msk [vmem:[#allocation2] sm:$0xff] %vm261_vm2, %v351_v16  ;;  %357 = vperm.xlu0 %695, %v351_v16  }
 0x18b   : > { %v353_v24 = vmul.f32 1.442695, %v352_v17 }
 0x208   : > { %v358_v19 = vpop.permute.xlu0 %357 }
 0x209   : > { %v360_v20 = vsub.f32 %v342_v10, %v358_v19 }
 0x20b   : > { %v361_v21 = vmul.f32 1.442695, %v360_v20 }
 0x20d   : > { %697 = vpow2.f32 %v361_v21 }
 0x20e   : > { %699 = vpow2.f32 %v353_v24 }
 0x217   : > { %v698_v22 = vpop.eup %697 }
 0x218   : > { %627 = vmatmul.mubr.msk.f32.vlgmr.msra.gmra.mrb[0].mxu1 %vm347_vm3, %v698_v22  ;;  %v365_v23 = vsel %vm347_vm3, %v698_v22, 0.0  ;;  %v700_v25 = vpop.eup %699 }
 0x219   : > { %366 = vadd.xlane.f32.xlu1 %v365_v23  ;;  %v364_v27 = vmul.f32 %v700_v25, %v363_v26 }
 0x22a   : > { %374 = vperm.xlu1 %696, %v700_v25  }
 0x2a6   : > { %v367_v28 = vpop.xlane.xlu1 %366 }
 0x2a7   : > { %v368_v29 = vadd.f32 %v367_v28, %v364_v27 }
 0x2a9   : > { %370 = vst.msk [vmem:[#allocation3] sm:$0xff] %vm261_vm2, %v368_v29 }
 0x2aa   : > { %v375_v33 = vpop.permute.xlu1 %374 }
 0x2ab   : > { %v377_v34 = vmul.f32 %v375_v33, %v371_v32 }
 0x2b0   : > { %v457_v30 = vld [vmem:[#allocation3] sm:$0xff] }
 0x2b1   : > { %701 = vrcp.f32 %v457_v30 }
 0x2bb   : > { %v702_v31 = vpop.eup %701 }
 0x2bc   : > { %462 = vperm.xlu1 %696, %v702_v31  }
 0x2eb   : > { %v447_v35 = vpop.f32.mrb[0].mxu1 }
 0x2ec   : > { %v451_v36 = vadd.f32 %v447_v35, %v377_v34  ;;  %v628_v37 = vpop.f32.mrb[1].mxu1 }
 0x2ee   : > { %452 = vst.msk [vmem:[#allocation4] sm:$0xff] %vm264_vm0, %v451_v36 }
 0x2f5   : > { %v459_v38 = vld [vmem:[#allocation4] sm:$0xff] }
 0x33b   : > { %v463_v39 = vpop.permute.xlu1 %462 }
 0x33c   : > { %v465_v40 = vmul.f32 %v463_v39, %v459_v38 }
 0x33e   : > { %466 = vst.msk [vmem:[%s234_s21] sm:$0xff] %vm264_vm0, %v465_v40 }
 0x33f   : > { %716 = shalt.err (!%p713_p5)
}
 0x340   : > { %s717_s6 = scalar_lea.hbm %s894_s28, 128  ;;  %s721_s9 = scalar_lea.hbm %s945_s3, 512 }
 0x341   : > { %p718_p6 = scmp.ne.s32.totalorder %s894_s28, %s717_s6  ;;  %p722_p10 = scmp.lt.u32.totalorder %s894_s28, %s945_s3 }
 0x342   : > { %p723_p11 = scmp.lt.u32.totalorder %s721_s9, %s717_s6  ;;  %p725_p13 = scmp.lt.u32.totalorder %s717_s6, %s894_s28 }
 0x343   : > { %p719_p7 = pnand %p718_p6, %p849_p4 }
 0x344   : > { %p724_p12 = por %p723_p11, %p722_p10 }
 0x345   : > { %p720_p9 = pneg %p719_p7 }
 0x346   : > { %p726_p0 = por %p725_p13, %p724_p12 }
 0x348   : > { %p727_p1 = pnand %p726_p0, %p720_p9 }
 0x34a   : > { %730 = shalt.err (!%p727_p1)
}
 0x34b   : > { %635 = dma.vmem_to_hbm [thread:$0]  (%p849_p4), %s896_s23, 128, %s894_s28, %s468_s29  }
 0x34c PF: > { %p641_p2 = scmp.ge.s32.totalorder %s781_s17, 2  ;;  %s494_s18 = sand.u32 1, %s761_s12  }
 0x34d   : > { %s495_s19 = scalar_lea.sflag [#allocation6], %s494_s18 }
 0x34e   : > { %p638_p3 = pnand %p641_p2, %p856_p8 }
 0x350   : > { %756 = dma.done.wait (!%p638_p3), %s495_s19, 128  }
 0x351   : > { %758 = vsyncadd (!%p638_p3), %s495_s19, 4294967168  ;;  %s16_s17 = sadd.s32 1, %s781_s17   ;;  %s948_s12 = smov %s765_s13 }
 0x352   : > { %p13_p5 = scmp.ge.s32.totalorder %s16_s17, 6   ;;  %s949_s13 = smov %s769_s14 }
 0x353   : > { %s950_s14 = smov %s862_s25  ;;  %s951_s15 = smov %s777_s16 }
 0x354   : > { %s952_s16 = smov %s954_s20  ;;  %15 = sbr.rel (!%p13_p5) target bundleno = 4 (0x4), region = 81 }
 0x35b   :  { %500 = vsyncpa [#allocation6], 1 }
 0x35c   :  { %502 = vsyncpa [#allocation6 + $0x1], 1 }

</bundles_post_ra>
